<compile_context>
chip_gen: v6e
topology: v6e:2x2x1
jax: 0.10.0
libtpu: 0.0.40
codegen_flags: <defaults>
</compile_context>

<pallas_src>
import functools

import jax
import jax.numpy as jnp
import numpy as np
from jax.experimental import pallas as pl
from jax.experimental.pallas import tpu as pltpu


def _round_up(x, m):
    return (x + m - 1) // m * m


# ---------------------------------------------------------------------------
# Pallas kernel: 3-hot token indicator -> rolled im2col -> ONE folded matmul
# (gather + linear_map + all conv filters) -> ReLU -> mask -> max-pool -> fc.
# One grid step processes b_tile batches (R = b_tile * S stacked token rows).
# ---------------------------------------------------------------------------
def _textcnn_kernel(S, b_tile, max_fs, v_pad,
                    ids_ref, big_w_ref, conv_b_ref, mask_ref,
                    w_fc_ref, b_fc_ref, out_ref):
    R = b_tile * S
    c_pad = conv_b_ref.shape[-1]

    # 3-hot indicator over the concatenated (onset | tone | rhyme) vocab.
    ids = ids_ref[...]                                           # [R, 3] int32
    lane = jax.lax.broadcasted_iota(jnp.int32, (R, v_pad), 1)
    hit = ((lane == ids[:, 0:1]) |
           (lane == ids[:, 1:2]) |
           (lane == ids[:, 2:3]))
    multihot = jnp.where(hit, 1.0, 0.0)                          # [R, v_pad] f32

    # Im2col over the sequence taps: rolled copies along the row axis,
    # lane-concatenated (each piece is a full 128-lane slab -> aligned).
    pieces = [multihot] + [jnp.roll(multihot, -r, axis=0)
                           for r in range(1, max_fs)]
    im2col = pieces[0] if max_fs == 1 else jnp.concatenate(pieces, axis=1)

    # ONE matmul performs embedding gather + linear_map + every conv filter
    # (weights folded offline in the wrapper).  Bias added once, then ReLU.
    conved = jnp.dot(im2col.astype(big_w_ref.dtype), big_w_ref[...],
                     preferred_element_type=jnp.float32)         # [R, c_pad]
    conved = jnp.maximum(conved + conv_b_ref[...], 0.0)

    # Zero rows whose conv window crosses a batch boundary (per filter-size
    # group).  ReLU output is >= 0, so zeros never win the max-pool.
    conved = conved.reshape(b_tile, S, c_pad) * mask_ref[...][None, :, :]
    pooled = jnp.max(conved, axis=1)                             # [b_tile, c_pad]

    # Dropout is identity at inference.  fc is lane-padded to 128 outputs so
    # the store is a dense [b_tile, 128] slab.
    out_ref[...] = (jnp.dot(pooled.astype(w_fc_ref.dtype), w_fc_ref[...],
                            preferred_element_type=jnp.float32)
                    + b_fc_ref[...])


# ---------------------------------------------------------------------------
# Wrapper: offline weight folding / padding + pallas_call.
# ---------------------------------------------------------------------------
def textcnn_vipher_forward(x_tokens, emb_onset, emb_tone, emb_rhyme,
                           w_map, b_map, conv_ws, conv_bs, w_fc, b_fc,
                           filter_sizes, n_filters, *, b_tile=None,
                           use_bf16_mxu=False):
    B, S, _ = x_tokens.shape
    D = w_map.shape[1]
    out_dim = w_fc.shape[1]
    n_fs = len(filter_sizes)
    max_fs = max(filter_sizes)
    if S < max_fs:
        # PyTorch's Conv2d would error for S < fs; the roll+mask trick needs
        # at least one valid output row per filter size as well.
        raise ValueError("sequence length must be >= max(filter_sizes)")

    C = n_fs * n_filters
    c_pad = _round_up(C, 128)             # lane-dense conv/pool width
    out_pad = _round_up(out_dim, 128)     # lane-dense output width

    v_onset = emb_onset.shape[0]
    v_tone = emb_tone.shape[0]
    v_rhyme = emb_rhyme.shape[0]
    v_pad = _round_up(v_onset + v_tone + v_rhyme, 128)
    hp = jax.lax.Precision.HIGHEST        # keep the offline folds exact f32

    # ---- fold linear_map into the embedding tables -------------------------
    # linear_map input order is cat(rhyme, tone, onset) -> split w_map rows.
    wmap_r = w_map[0 * D:1 * D]
    wmap_t = w_map[1 * D:2 * D]
    wmap_o = w_map[2 * D:3 * D]
    fused = jnp.concatenate(
        [jnp.dot(emb_onset, wmap_o, precision=hp),
         jnp.dot(emb_tone, wmap_t, precision=hp),
         jnp.dot(emb_rhyme, wmap_r, precision=hp)], axis=0)      # [V_total, D]
    fused = jnp.pad(fused, ((0, v_pad - fused.shape[0]), (0, 0)))

    # ---- pack every filter size's conv weights + build the row mask --------
    conv_w_packed = jnp.zeros((max_fs, D, c_pad), jnp.float32)
    conv_b_packed = jnp.zeros((1, c_pad), jnp.float32)
    mask_np = np.zeros((S, c_pad), np.float32)
    for g, (fs, cw, cb) in enumerate(zip(filter_sizes, conv_ws, conv_bs)):
        lo, hi = g * n_filters, (g + 1) * n_filters
        conv_w_packed = conv_w_packed.at[:fs, :, lo:hi].set(cw)
        conv_b_packed = conv_b_packed.at[:, lo:hi].set(cb)
        mask_np[:S - fs + 1, lo:hi] = 1.0        # valid output rows 0..S-fs
    mask = jnp.asarray(mask_np)                  # passed as a VMEM input

    # conv(emb + b_map) == conv(emb) + sum_r b_map @ W[r]  -> fold b_map away.
    conv_b_eff = conv_b_packed + jnp.einsum(
        'd,rdc->c', b_map.reshape(-1), conv_w_packed, precision=hp)[None, :]

    # Fold gather + linear_map + conv into ONE weight [max_fs*v_pad, c_pad].
    big_w = jnp.einsum('vd,rdc->rvc', fused, conv_w_packed,
                       precision=hp).reshape(max_fs * v_pad, c_pad)

    w_fc_pad = jnp.zeros((c_pad, out_pad), jnp.float32).at[:C, :out_dim].set(w_fc)
    b_fc_pad = jnp.zeros((1, out_pad), jnp.float32).at[:, :out_dim].set(b_fc)

    if use_bf16_mxu:                      # production option for v6e / v7x
        big_w = big_w.astype(jnp.bfloat16)
        w_fc_pad = w_fc_pad.astype(jnp.bfloat16)

    # ---- batch tiling -------------------------------------------------------
    if b_tile is None:
        B8 = _round_up(B, 8)
        # Target ~512 stacked rows per grid step ...
        b_tile = max(8, min(_round_up(max(512 // S, 1), 8), B8))
        # ... but keep >= 2 grid steps when the batch allows so both v7x
        # TensorCores get work (harmless short loop on v5e/v6e).
        while b_tile > 8 and B8 // b_tile < 2:
            b_tile -= 8
    if b_tile % 8 != 0:
        raise ValueError("b_tile must be a multiple of 8")
    B_pad = _round_up(B, b_tile)
    R = b_tile * S

    # Offset each id column into the concatenated vocab; pad the batch.
    # TODO(synk): ids are assumed valid (0 <= id < vocab); nn.Embedding would
    # raise on out-of-range ids, the one-hot gather silently yields zeros.
    offsets = jnp.asarray([0, v_onset, v_onset + v_tone], jnp.int32)
    ids = x_tokens.astype(jnp.int32) + offsets
    if B_pad != B:
        ids = jnp.concatenate(
            [ids, jnp.zeros((B_pad - B, S, 3), jnp.int32)], axis=0)
    ids_flat = ids.reshape(B_pad * S, 3)

    grid = (B_pad // b_tile,)
    kernel = functools.partial(_textcnn_kernel, S, b_tile, max_fs, v_pad)

    out = pl.pallas_call(
        kernel,
        out_shape=jax.ShapeDtypeStruct((B_pad, out_pad), jnp.float32),
        grid=grid,
        in_specs=[
            pl.BlockSpec((R, 3), lambda i: (i, 0)),                   # ids
            pl.BlockSpec((max_fs * v_pad, c_pad), lambda i: (0, 0)),  # folded W
            pl.BlockSpec((1, c_pad), lambda i: (0, 0)),               # conv bias
            pl.BlockSpec((S, c_pad), lambda i: (0, 0)),               # row mask
            pl.BlockSpec((c_pad, out_pad), lambda i: (0, 0)),         # fc W
            pl.BlockSpec((1, out_pad), lambda i: (0, 0)),             # fc bias
        ],
        out_specs=pl.BlockSpec((b_tile, out_pad), lambda i: (i, 0)),
        compiler_params=pltpu.CompilerParams(
            dimension_semantics=("parallel",)),
    )(ids_flat, big_w, conv_b_eff, mask, w_fc_pad, b_fc_pad)

    return out[:B, :out_dim]


# ---------------------------------------------------------------------------
# Pure-JAX reference (mirrors the PyTorch forward; for the correctness check).
# ---------------------------------------------------------------------------
def reference_forward(x_tokens, emb_onset, emb_tone, emb_rhyme,
                      w_map, b_map, conv_ws, conv_bs, w_fc, b_fc,
                      filter_sizes):
    hp = jax.lax.Precision.HIGHEST
    onset = x_tokens[:, :, 0]
    tone = x_tokens[:, :, 1]
    rhyme = x_tokens[:, :, 2]
    r_e = jnp.take(emb_rhyme, rhyme, axis=0)
    t_e = jnp.take(emb_tone, tone, axis=0)
    o_e = jnp.take(emb_onset, onset, axis=0)
    cat = jnp.concatenate([r_e, t_e, o_e], axis=-1)                 # [B, S, 3D]
    emb = jnp.einsum('bsk,kd->bsd', cat, w_map, precision=hp) + b_map
    B, S = x_tokens.shape[0], x_tokens.shape[1]
    pooled = []
    for fs, cw, cb in zip(filter_sizes, conv_ws, conv_bs):
        L = S - fs + 1
        acc = jnp.zeros((B, L, cw.shape[-1]), jnp.float32) + cb
        for r in range(fs):
            acc = acc + jnp.einsum('bld,df->blf', emb[:, r:r + L, :], cw[r],
                                   precision=hp)
        pooled.append(jnp.max(jnp.maximum(acc, 0.0), axis=1))       # [B, NF]
    cat_p = jnp.concatenate(pooled, axis=1)
    return jnp.einsum('bk,ko->bo', cat_p, w_fc, precision=hp) + b_fc


# ---------------------------------------------------------------------------
# Main
# ---------------------------------------------------------------------------
if __name__ == "__main__":
    # Small synthetic config mirroring the module's __init__.
    B, S = 16, 8
    D = 32                       # embedding_dim
    n_filters = 8
    filter_sizes = [2, 3, 4]
    output_dim = 4
    pad_idx = 0
    vocab_sizes = {"onset": 24, "tone": 8, "rhyme": 20}

    key = jax.random.PRNGKey(0)
    keys = jax.random.split(key, 16)

    # Embedding tables (padding_idx row zeroed, as in nn.Embedding).
    def make_emb(k, n):
        t = jax.random.normal(k, (n, D), jnp.float32) * 0.1
        return t.at[pad_idx].set(0.0)

    emb_rhyme = make_emb(keys[0], vocab_sizes["rhyme"])
    emb_tone = make_emb(keys[1], vocab_sizes["tone"])
    emb_onset = make_emb(keys[2], vocab_sizes["onset"])

    # linear_map: Linear(3D -> D); stored as [3D, D] (x @ W) plus bias [1, D].
    w_map = jax.random.normal(keys[3], (3 * D, D), jnp.float32) * 0.05
    b_map = jax.random.normal(keys[4], (1, D), jnp.float32) * 0.05

    # Conv2d(1, NF, (fs, D)) weights stored as [fs, D, NF], bias as [1, NF].
    conv_ws, conv_bs = [], []
    for i, fs in enumerate(filter_sizes):
        conv_ws.append(
            jax.random.normal(keys[5 + i], (fs, D, n_filters), jnp.float32)
            * 0.05)
        conv_bs.append(
            jax.random.normal(keys[8 + i], (1, n_filters), jnp.float32) * 0.05)

    # fc: Linear(len(fs)*NF -> output_dim), stored as [K, out_dim] + [1, out].
    w_fc = jax.random.normal(
        keys[11], (len(filter_sizes) * n_filters, output_dim), jnp.float32) * 0.1
    b_fc = jax.random.normal(keys[12], (1, output_dim), jnp.float32) * 0.1

    # Input token ids: [B, S, 3] = (onset, tone, rhyme).
    onset_ids = jax.random.randint(keys[13], (B, S), 0, vocab_sizes["onset"])
    tone_ids = jax.random.randint(keys[14], (B, S), 0, vocab_sizes["tone"])
    rhyme_ids = jax.random.randint(keys[15], (B, S), 0, vocab_sizes["rhyme"])
    x_tokens = jnp.stack([onset_ids, tone_ids, rhyme_ids], axis=-1)  # [B,S,3]

    # TODO(synk): the labels / CrossEntropyLoss branch of forward() is not
    # implemented (inference-only logits path; dropout is identity at eval).
    logits = textcnn_vipher_forward(
        x_tokens, emb_onset, emb_tone, emb_rhyme, w_map, b_map,
        conv_ws, conv_bs, w_fc, b_fc, filter_sizes, n_filters)
    logits = jax.block_until_ready(logits)

    ref = reference_forward(x_tokens, emb_onset, emb_tone, emb_rhyme,
                            w_map, b_map, conv_ws, conv_bs, w_fc, b_fc,
                            filter_sizes)
    # Tolerance slightly looser than pure f32 round-off: the offline weight
    # folding (table@wmap@conv) reassociates the f32 sums.
    np.testing.assert_allclose(np.asarray(logits), np.asarray(ref),
                               rtol=1e-3, atol=1e-4)
    print("KERNEL_OK")
</pallas_src>

<mosaic_0001>
module attributes {stable_mosaic.version = 11 : i64} {
  func.func @_textcnn_kernel(%arg0: i32, %arg1: memref<64x3xi32, #tpu.memory_space<vmem>>, %arg2: memref<512x128xf32, #tpu.memory_space<vmem>>, %arg3: memref<1x128xf32, #tpu.memory_space<vmem>>, %arg4: memref<8x128xf32, #tpu.memory_space<vmem>>, %arg5: memref<128x128xf32, #tpu.memory_space<vmem>>, %arg6: memref<1x128xf32, #tpu.memory_space<vmem>>, %arg7: memref<8x128xf32, #tpu.memory_space<vmem>>) attributes {dimension_semantics = [#tpu.dimension_semantics<parallel>], iteration_bounds = array<i64: 2>, scalar_prefetch = 0 : i64, scratch_operands = 0 : i64, tpu.core_type = #tpu.core_type<tc>, window_params = [{transform_indices = @transform_0, window_bounds = array<i64: 64, 3>}, {pipeline_mode = #tpu.pipeline_mode<synchronous>, transform_indices = @transform_1, window_bounds = array<i64: 512, 128>}, {pipeline_mode = #tpu.pipeline_mode<synchronous>, transform_indices = @transform_2, window_bounds = array<i64: 1, 128>}, {pipeline_mode = #tpu.pipeline_mode<synchronous>, transform_indices = @transform_3, window_bounds = array<i64: 8, 128>}, {pipeline_mode = #tpu.pipeline_mode<synchronous>, transform_indices = @transform_4, window_bounds = array<i64: 128, 128>}, {pipeline_mode = #tpu.pipeline_mode<synchronous>, transform_indices = @transform_5, window_bounds = array<i64: 1, 128>}, {transform_indices = @transform_6, window_bounds = array<i64: 8, 128>}]} {
    %c0 = arith.constant 0 : index
    %c0_0 = arith.constant 0 : index
    %0 = vector.load %arg1[%c0, %c0_0] : memref<64x3xi32, #tpu.memory_space<vmem>>, vector<64x3xi32>
    %1 = tpu.iota {dimensions = array<i32: 1>} : vector<64x128xi32>
    %2 = vector.extract_strided_slice %0 {offsets = [0, 0], sizes = [64, 1], strides = [1, 1]} : vector<64x3xi32> to vector<64x1xi32>
    %3 = vector.broadcast %2 : vector<64x1xi32> to vector<64x128xi32>
    %4 = arith.cmpi eq, %1, %3 : vector<64x128xi32>
    %5 = vector.extract_strided_slice %0 {offsets = [0, 1], sizes = [64, 1], strides = [1, 1]} : vector<64x3xi32> to vector<64x1xi32>
    %6 = vector.broadcast %5 : vector<64x1xi32> to vector<64x128xi32>
    %7 = arith.cmpi eq, %1, %6 : vector<64x128xi32>
    %8 = arith.ori %4, %7 : vector<64x128xi1>
    %9 = vector.extract_strided_slice %0 {offsets = [0, 2], sizes = [64, 1], strides = [1, 1]} : vector<64x3xi32> to vector<64x1xi32>
    %10 = vector.broadcast %9 : vector<64x1xi32> to vector<64x128xi32>
    %11 = arith.cmpi eq, %1, %10 : vector<64x128xi32>
    %12 = arith.ori %8, %11 : vector<64x128xi1>
    %cst = arith.constant 1.000000e+00 : f32
    %cst_1 = arith.constant 0.000000e+00 : f32
    %13 = vector.broadcast %cst : f32 to vector<64x128xf32>
    %14 = vector.broadcast %cst_1 : f32 to vector<64x128xf32>
    %15 = arith.select %12, %13, %14 : vector<64x128xi1>, vector<64x128xf32>
    %16 = vector.extract_strided_slice %15 {offsets = [1, 0], sizes = [63, 128], strides = [1, 1]} : vector<64x128xf32> to vector<63x128xf32>
    %17 = vector.extract_strided_slice %15 {offsets = [0, 0], sizes = [1, 128], strides = [1, 1]} : vector<64x128xf32> to vector<1x128xf32>
    %18 = tpu.concatenate %16, %17 in 0 : vector<63x128xf32>, vector<1x128xf32> -> vector<64x128xf32>
    %19 = vector.extract_strided_slice %15 {offsets = [2, 0], sizes = [62, 128], strides = [1, 1]} : vector<64x128xf32> to vector<62x128xf32>
    %20 = vector.extract_strided_slice %15 {offsets = [0, 0], sizes = [2, 128], strides = [1, 1]} : vector<64x128xf32> to vector<2x128xf32>
    %21 = tpu.concatenate %19, %20 in 0 : vector<62x128xf32>, vector<2x128xf32> -> vector<64x128xf32>
    %22 = vector.extract_strided_slice %15 {offsets = [3, 0], sizes = [61, 128], strides = [1, 1]} : vector<64x128xf32> to vector<61x128xf32>
    %23 = vector.extract_strided_slice %15 {offsets = [0, 0], sizes = [3, 128], strides = [1, 1]} : vector<64x128xf32> to vector<3x128xf32>
    %24 = tpu.concatenate %22, %23 in 0 : vector<61x128xf32>, vector<3x128xf32> -> vector<64x128xf32>
    %25 = tpu.concatenate %15, %18, %21, %24 in 1 : vector<64x128xf32>, vector<64x128xf32>, vector<64x128xf32>, vector<64x128xf32> -> vector<64x512xf32>
    %c0_2 = arith.constant 0 : index
    %c0_3 = arith.constant 0 : index
    %26 = vector.load %arg2[%c0_2, %c0_3] : memref<512x128xf32, #tpu.memory_space<vmem>>, vector<512x128xf32>
    %cst_4 = arith.constant dense<0.000000e+00> : vector<64x128xf32>
    %27 = tpu.matmul %25, %26, %cst_4 {dimension_numbers = #tpu.dot_dimension_numbers<[1], [0], [0], [1], [0, 0, 1, 1], [], []>} : vector<64x512xf32>, vector<512x128xf32>, vector<64x128xf32> -> vector<64x128xf32>
    %c0_5 = arith.constant 0 : index
    %c0_6 = arith.constant 0 : index
    %28 = vector.load %arg3[%c0_5, %c0_6] : memref<1x128xf32, #tpu.memory_space<vmem>>, vector<1x128xf32>
    %29 = vector.broadcast %28 : vector<1x128xf32> to vector<64x128xf32>
    %30 = arith.addf %27, %29 : vector<64x128xf32>
    %cst_7 = arith.constant 0.000000e+00 : f32
    %31 = vector.broadcast %cst_7 : f32 to vector<64x128xf32>
    %32 = arith.maximumf %30, %31 : vector<64x128xf32>
    %33 = vector.shape_cast %32 : vector<64x128xf32> to vector<8x8x128xf32>
    %c0_8 = arith.constant 0 : index
    %c0_9 = arith.constant 0 : index
    %34 = vector.load %arg4[%c0_8, %c0_9] : memref<8x128xf32, #tpu.memory_space<vmem>>, vector<8x128xf32>
    %35 = vector.shape_cast %34 : vector<8x128xf32> to vector<1x8x128xf32>
    %36 = vector.broadcast %35 : vector<1x8x128xf32> to vector<8x8x128xf32>
    %37 = arith.mulf %33, %36 : vector<8x8x128xf32>
    %cst_10 = arith.constant dense<0xFF800000> : vector<8x128xf32>
    %38 = vector.multi_reduction <maximumf>, %37, %cst_10 [1] : vector<8x8x128xf32> to vector<8x128xf32>
    %c0_11 = arith.constant 0 : index
    %c0_12 = arith.constant 0 : index
    %39 = vector.load %arg5[%c0_11, %c0_12] : memref<128x128xf32, #tpu.memory_space<vmem>>, vector<128x128xf32>
    %cst_13 = arith.constant dense<0.000000e+00> : vector<8x128xf32>
    %40 = tpu.matmul %38, %39, %cst_13 {dimension_numbers = #tpu.dot_dimension_numbers<[1], [0], [0], [1], [0, 0, 1, 1], [], []>} : vector<8x128xf32>, vector<128x128xf32>, vector<8x128xf32> -> vector<8x128xf32>
    %c0_14 = arith.constant 0 : index
    %c0_15 = arith.constant 0 : index
    %41 = vector.load %arg6[%c0_14, %c0_15] : memref<1x128xf32, #tpu.memory_space<vmem>>, vector<1x128xf32>
    %42 = vector.broadcast %41 : vector<1x128xf32> to vector<8x128xf32>
    %43 = arith.addf %40, %42 : vector<8x128xf32>
    %c0_16 = arith.constant 0 : index
    %c0_17 = arith.constant 0 : index
    %44 = vector.load %arg7[%c0_16, %c0_17] : memref<8x128xf32, #tpu.memory_space<vmem>>, vector<8x128xf32>
    tpu.vector_store %arg7[%c0_16, %c0_17], %43 {strides = array<i32>} : memref<8x128xf32, #tpu.memory_space<vmem>>, vector<8x128xf32>,
    return
  }
  func.func @transform_0(%arg0: i32) -> (i32, i32) {
    %c0_i32 = arith.constant 0 : i32
    %c0_i32_0 = arith.constant 0 : i32
    return %arg0, %c0_i32 : i32, i32
  }
  func.func @transform_1(%arg0: i32) -> (i32, i32) {
    %c0_i32 = arith.constant 0 : i32
    %c0_i32_0 = arith.constant 0 : i32
    %c0_i32_1 = arith.constant 0 : i32
    return %c0_i32, %c0_i32_0 : i32, i32
  }
  func.func @transform_2(%arg0: i32) -> (i32, i32) {
    %c0_i32 = arith.constant 0 : i32
    %c0_i32_0 = arith.constant 0 : i32
    %c0_i32_1 = arith.constant 0 : i32
    return %c0_i32, %c0_i32_0 : i32, i32
  }
  func.func @transform_3(%arg0: i32) -> (i32, i32) {
    %c0_i32 = arith.constant 0 : i32
    %c0_i32_0 = arith.constant 0 : i32
    %c0_i32_1 = arith.constant 0 : i32
    return %c0_i32, %c0_i32_0 : i32, i32
  }
  func.func @transform_4(%arg0: i32) -> (i32, i32) {
    %c0_i32 = arith.constant 0 : i32
    %c0_i32_0 = arith.constant 0 : i32
    %c0_i32_1 = arith.constant 0 : i32
    return %c0_i32, %c0_i32_0 : i32, i32
  }
  func.func @transform_5(%arg0: i32) -> (i32, i32) {
    %c0_i32 = arith.constant 0 : i32
    %c0_i32_0 = arith.constant 0 : i32
    %c0_i32_1 = arith.constant 0 : i32
    return %c0_i32, %c0_i32_0 : i32, i32
  }
  func.func @transform_6(%arg0: i32) -> (i32, i32) {
    %c0_i32 = arith.constant 0 : i32
    %c0_i32_0 = arith.constant 0 : i32
    return %arg0, %c0_i32 : i32, i32
  }
}

</mosaic_0001>

<bundles_post_ra>
// kernel: tpu_custom_call.1
= control target key start
LH: loop header
LB: loop body
LE: loop exit
PB: predicated region body
PF: predicated region fallthrough
CT: control target
= control target key end

     0   :  { %11 = vsyncpa [#allocation3], 0  ;;  %s1817_s0 = inlined_call_operand.vmem [shape: s32[128,3], index: 0, kind: input, shape index: {}]   ;;  %s1818_s1 = inlined_call_operand.hbm [shape: f32[512,128], index: 1, kind: input, shape index: {}]   ;;  %s1819_s2 = inlined_call_operand.vmem [shape: f32[1,128], index: 2, kind: input, shape index: {}]   ;;  %s1820_s3 = inlined_call_operand.vmem [shape: f32[8,128], index: 3, kind: input, shape index: {}]   ;;  %s1821_s4 = inlined_call_operand.vmem [shape: f32[128,128], index: 4, kind: input, shape index: {}]   ;;  %s1822_s5 = inlined_call_operand.vmem [shape: f32[1,128], index: 5, kind: input, shape index: {}]   ;;  %s1823_s6 = inlined_call_operand.hbm [shape: f32[16,128], index: 6, kind: output, shape index: {}]  }
   0x1   :  { %12 = vsyncpa [#allocation4], 0 }
   0x2   :  { %14 = vsyncpa [#allocation4 + $0x1], 0  ;;  %s1432_s21 = smov 0   ;;  %s1434_s22 = smov 0  }
   0x3   :  { %s1436_s23 = smov 0   ;;  %s1438_s24 = smov 0  }
   0x4 LB: > { %s1453_s25 = sadd.s32 4294967295, %s1385_s24   ;;  %s1031_s26 = sadd.s32 4294967294, %s1385_s24   ;;  %s1385_s24 = sphi %s1438_s24, %s1847_s24   ;;  %s1381_s23 = sphi %s1436_s23, %s1846_s23   ;;  %s1377_s22 = sphi %s1434_s22, %s1845_s22   ;;  %s1373_s21 = sphi %s1432_s21, %s1844_s21  }
   0x5   : > { %s1457_s27 = sadd.s32 1, %s1385_s24   ;;  %s158_s28 = sadd.s32 1, %s1381_s23 }
   0x6   : > { %s155_s29 = ssub.s32 %s1385_s24, %s1457_s27  ;;  %p168_p0 = scmp.ne.s32.totalorder %s1381_s23, %s1377_s22 }
   0x7   : > { %p156_p1 = scmp.eq.s32.totalorder %s155_s29, 0  ;;  %p169_p2 = scmp.eq.s32.totalorder %s1453_s25, 1 }
   0x8   : > { %p174_p3 = scmp.ne.s32.totalorder %s1377_s22, %s1373_s21  ;;  %p175_p4 = scmp.eq.s32.totalorder %s1031_s26, 1 }
   0x9   : > { %s1468_s30 = scalar_select %p156_p1, %s1381_s23, %s158_s28  }
   0xa   : > { %p1470_p5 = por %p169_p2, %p168_p0  ;;  %p1474_p6 = por %p175_p4, %p174_p3 }
   0xb   : > { %p1032_p7 = scmp.ge.s32.totalorder %s1385_s24, 1  ;;  %p182_p8 = scmp.lt.s32.totalorder %s1385_s24, 3 }
   0xc   : > { %s1825_s8 = scalar_select %p1474_p6, 1, 0 }
   0xd   : > { %p1232_p9 = scmp.eq.s32.totalorder %s1453_s25, 0  ;;  %p1481_p10 = pnand %p1032_p7, %p182_p8 }
   0xe   : > { %s1387_s10 = smov [#allocation2]  }
   0xf   : > { %s194_s11 = sshll.u32 %s1387_s10, 4  ;;  %p1224_p11 = pneg %p1481_p10  ;;  %s195_s11 = int_to_ptr.vmem [resolvable:$true] %s194_s11 }
  0x10   : > { %s1306_s12 = scalar_lea.vmem %s195_s11, 8192  ;;  %p1314_p3 = scmp.lt.s32.totalorder %s195_s11, %s195_s11 }
  0x11   : > { %p1225_p12 = pnand %p1232_p9, %p1224_p11  ;;  %p1307_p0 = scmp.ne.s32.totalorder %s195_s11, %s1306_s12 }
  0x12   : > { %p1315_p4 = scmp.lt.s32.totalorder %s1306_s12, %s1306_s12 }
  0x13   : > { %p1297_p13 = pneg %p1225_p12 }
  0x14   : > { %p1316_p6 = por %p1315_p4, %p1314_p3 }
  0x15   : > { %p1309_p1 = pnand %p1307_p0, %p1297_p13 }
  0x17   : > { %p1310_p2 = pneg %p1309_p1 }
  0x19   : > { %p1317_p7 = pnand %p1316_p6, %p1310_p2 }
  0x1b   : > { %1320 = shalt.err (!%p1317_p7)
}
  0x1c   : > { %s1388_s13 = smov 128   ;;  %s1389_s14 = smov 8  }
  0x1d   : > { %1227 = dma.hbm_to_vmem [thread:$0]  (!%p1225_p12), %s1818_s1, 8192, %s195_s11, [#allocation3], %s1388_s13, %s1388_s13, %s1389_s14  }
  0x1e   : > { %231 = sbr.rel (%p1481_p10) target bundleno = 668 (0x29c), region = 44 }
  0x23   : > { %1364 = dma.done.wait (%p1232_p9), [#allocation3], 8192  }
  0x24   : > { %1366 = vsyncadd (%p1232_p9), [#allocation3], 4294959104  ;;  %s1038_s17 = sshll.u32 %s1453_s25, 3  ;;  %v1390_v0 = vmov 2   ;;  %v1391_v1 = vmov 1   ;;  %v514_v5 = vld [vmem:[#allocation2 + $0xf8] sm:$0xff] }
  0x25   : > { %1277 = vset.pattern.permute.xlu0 %v1390_v0  ;;  %1276 = vset.pattern.permute.xlu1 %v1391_v1  ;;  %p262_p6 = scmp.lt.s32.totalorder %s1038_s17, 15  ;;  %v546_v6 = vld [vmem:[#allocation2 + $0x1f8] sm:$0xff]  ;;  %v513_v9 = vld [vmem:[#allocation2 + $0xf0] sm:$0xff]  ;;  %v512_v13 = vld [vmem:[#allocation2 + $0xe8] sm:$0xff]  ;;  %v1392_v23 = vmov 0   ;;  %vm405_vm14 = vcmask 1046528  }
  0x26   : > { %1054 = vmatprep.subr.mxu0 %v514_v5  ;;  %v498_v7 = vld [vmem:[#allocation2 + $0x78] sm:$0xff]  ;;  %1110 = vmatprep.subr.mxu1 %v546_v6  ;;  %v545_v10 = vld [vmem:[#allocation2 + $0x1f0] sm:$0xff]  ;;  %v544_v15 = vld [vmem:[#allocation2 + $0x1e8] sm:$0xff]  ;;  %vm457_vm15 = vcmask 1044480   ;;  %s258_s13 = sand.u32 1, %s1377_s22   ;;  %s1396_s10 = smov [#allocation5]  }
  0x27   : > { %s1849_s17 = smov (!%p262_p6, %s1038_s17), 15  ;;  %v530_v8 = vld [vmem:[#allocation2 + $0x178] sm:$0xff]  ;;  %1055 = vmatpush3.msra.mxu0 %v498_v7  ;;  %v497_v11 = vld [vmem:[#allocation2 + $0x70] sm:$0xff]  ;;  %v496_v16 = vld [vmem:[#allocation2 + $0x68] sm:$0xff]  ;;  %s1037_s14 = sshll.u32 %s258_s13, 3 }
  0x28   : > { %s1039_s18 = sshll.u32 %s1849_s17, 3  ;;  %v529_v12 = vld [vmem:[#allocation2 + $0x170] sm:$0xff]  ;;  %1111 = vmatpush3.msra.mxu1 %v530_v8  ;;  %1056 = vmatprep.subr.mxu0 %v513_v9  ;;  %v528_v17 = vld [vmem:[#allocation2 + $0x168] sm:$0xff]  ;;  %v511_v18 = vld [vmem:[#allocation2 + $0xe0] sm:$0xff]  ;;  %s1051_s17 = sshll.u32 %s1453_s25, 7 }
  0x29   : > { %s1504_s26 = scalar_lea.vmem %s1817_s0, %s1039_s18  ;;  %1112 = vmatprep.subr.mxu1 %v545_v10  ;;  %1057 = vmatpush3.msra.mxu0 %v497_v11  ;;  %v543_v19 = vld [vmem:[#allocation2 + $0x1e0] sm:$0xff]  ;;  %v510_v22 = vld [vmem:[#allocation2 + $0xd8] sm:$0xff]  ;;  %v509_v27 = vld [vmem:[#allocation2 + $0xd0] sm:$0xff]  ;;  %s260_s18 = scalar_lea.vmem [#allocation5], %s1037_s14 }
  0x2a   : > { %v267_v2 = vld [vmem:[%s1504_s26] sm:$0xff]  ;;  %v268_v3 = vld [vmem:[%s1504_s26 + $0x8] sm:$0xff]  ;;  %v269_v4 = vld [vmem:[%s1504_s26 + $0x10] sm:$0xff]  ;;  %1113 = vmatpush3.msra.mxu1 %v529_v12  ;;  %1058 = vmatprep.subr.mxu0 %v512_v13  ;;  %v1393_v13 = vmov 0.0   ;;  %s960_s19 = sshll.u32 %s260_s18, 4  ;;  %s1782_s28 = scalar_lea.hbm %s1823_s6, %s1051_s17  ;;  %s961_s19 = int_to_ptr.vmem [resolvable:$true] %s960_s19 }
  0x2b   : > { %350 = vperm.xlu0 %1277, %v267_v2   ;;  %310 = vperm.xlu1 %1276, %v267_v2   ;;  %v1511_v14 = vld [vmem:[%s1504_s26 + $0x18] sm:$0xff]  ;;  %v495_v20 = vld [vmem:[#allocation2 + $0x60] sm:$0xff]  ;;  %v541_v28 = vld [vmem:[#allocation2 + $0x1d0] sm:$0xff]  ;;  %s947_s29 = scalar_lea.sflag [#allocation4], %s258_s13  ;;  %s1321_s9 = scalar_lea.vmem %s961_s19, 128 }
  0x2c   : > { %1114 = vmatprep.subr.mxu1 %v544_v15  ;;  %1059 = vmatpush3.msra.mxu0 %v496_v16  ;;  %v527_v21 = vld [vmem:[#allocation2 + $0x160] sm:$0xff]  ;;  %v542_v24 = vld [vmem:[#allocation2 + $0x1d8] sm:$0xff]  ;;  %v493_v29 = vld [vmem:[#allocation2 + $0x50] sm:$0xff]  ;;  %p1322_p8 = scmp.ne.s32.totalorder %s961_s19, %s1321_s9  ;;  %s1325_s25 = sshll.u32 %s1396_s10, 4  ;;  %s1326_s25 = int_to_ptr.vmem [resolvable:$false] %s1325_s25 }
  0x2d   : > { %1115 = vmatpush3.msra.mxu1 %v528_v17  ;;  %1060 = vmatprep.subr.mxu0 %v511_v18  ;;  %v494_v25 = vld [vmem:[#allocation2 + $0x58] sm:$0xff]  ;;  %v525_v30 = vld [vmem:[#allocation2 + $0x150] sm:$0xff]  ;;  %v508_v31 = vld [vmem:[#allocation2 + $0xc8] sm:$0xff]  ;;  %v275_v18 = vlaneseq  ;;  %s1327_s11 = scalar_lea.vmem %s1326_s25, 256  ;;  %p1328_p11 = scmp.lt.s32.totalorder %s961_s19, %s1326_s25 }
  0x2e   : > { %1116 = vmatprep.subr.mxu1 %v543_v19  ;;  %1061 = vmatpush3.msra.mxu0 %v495_v20  ;;  %v526_v26 = vld [vmem:[#allocation2 + $0x158] sm:$0xff]  ;;  %v540_v32 = vld [vmem:[#allocation2 + $0x1c8] sm:$0xff]  ;;  %v1519_v33 = vld [vmem:[%s1504_s26 + $0x20] sm:$0xff]  ;;  %p1323_p9 = pnand %p1322_p8, %p1470_p5  ;;  %p1329_p12 = scmp.lt.s32.totalorder %s1327_s11, %s1321_s9 }
  0x2f   : > { %1280 = vset.pattern.permute.xlu0 %v1391_v1  ;;  %313 = vperm.xlu1 %1276, %v268_v3   ;;  %v492_v34 = vld [vmem:[#allocation2 + $0x48] sm:$0xff]  ;;  %v507_v36 = vld [vmem:[#allocation2 + $0xc0] sm:$0xff]  ;;  %v506_v41 = vld [vmem:[#allocation2 + $0xb8] sm:$0xff] }
  0x30   : > { %316 = vperm.xlu0 %1280, %v269_v4   ;;  %1117 = vmatpush3.msra.mxu1 %v527_v21  ;;  %v524_v35 = vld [vmem:[#allocation2 + $0x148] sm:$0xff]  ;;  %v539_v37 = vld [vmem:[#allocation2 + $0x1c0] sm:$0xff]  ;;  %v538_v42 = vld [vmem:[#allocation2 + $0x1b8] sm:$0xff]  ;;  %v1547_v21 = vand.u32 127, %v275_v18  ;;  %p1324_p10 = pneg %p1323_p9  ;;  %p1330_p13 = por %p1329_p12, %p1328_p11 }
  0x31   : > { %1062 = vmatprep.subr.mxu0 %v510_v22  ;;  %1118 = vmatprep.subr.mxu1 %v542_v24  ;;  %v491_v38 = vld [vmem:[#allocation2 + $0x40] sm:$0xff]  ;;  %v1524_v39 = vld [vmem:[%s1504_s26 + $0x28] sm:$0xff]  ;;  %v490_v43 = vld [vmem:[#allocation2 + $0x38] sm:$0xff] }
  0x32   : > { %1063 = vmatpush3.msra.mxu0 %v494_v25  ;;  %1119 = vmatpush3.msra.mxu1 %v526_v26  ;;  %v523_v40 = vld [vmem:[#allocation2 + $0x140] sm:$0xff]  ;;  %v522_v44 = vld [vmem:[#allocation2 + $0x138] sm:$0xff]  ;;  %v505_v45 = vld [vmem:[#allocation2 + $0xb0] sm:$0xff]  ;;  %p1331_p0 = pnand %p1330_p13, %p1324_p10 }
  0x33   : > { %1278 = vset.pattern.permute.xlu1 %v1390_v0  ;;  %1064 = vmatprep.subr.mxu0 %v509_v27  ;;  %v537_v46 = vld [vmem:[#allocation2 + $0x1b0] sm:$0xff]  ;;  %v504_v49 = vld [vmem:[#allocation2 + $0xa8] sm:$0xff]  ;;  %v503_v53 = vld [vmem:[#allocation2 + $0xa0] sm:$0xff] }
  0x34   : > { %319 = vperm.xlu0 %1280, %v1511_v14   ;;  %353 = vperm.xlu1 %1278, %v268_v3   ;;  %v489_v47 = vld [vmem:[#allocation2 + $0x30] sm:$0xff]  ;;  %v536_v50 = vld [vmem:[#allocation2 + $0x1a8] sm:$0xff]  ;;  %v535_v55 = vld [vmem:[#allocation2 + $0x1a0] sm:$0xff] }
  0x35   : > { %1120 = vmatprep.subr.mxu1 %v541_v28  ;;  %1065 = vmatpush3.msra.mxu0 %v493_v29  ;;  %v521_v48 = vld [vmem:[#allocation2 + $0x130] sm:$0xff]  ;;  %v488_v51 = vld [vmem:[#allocation2 + $0x28] sm:$0xff]  ;;  %v487_v56 = vld [vmem:[#allocation2 + $0x20] sm:$0xff] }
  0x36   : > { %1121 = vmatpush3.msra.mxu1 %v525_v30  ;;  %1066 = vmatprep.subr.mxu0 %v508_v31  ;;  %v520_v52 = vld [vmem:[#allocation2 + $0x128] sm:$0xff]  ;;  %v273_v54 = vld [vmem:[%s1504_s26 + $0x30] sm:$0xff]  ;;  %v519_v57 = vld [vmem:[#allocation2 + $0x120] sm:$0xff] }
  0x37   : > { %1122 = vmatprep.subr.mxu1 %v540_v32  ;;  %1067 = vmatpush3.msra.mxu0 %v492_v34  ;;  %v274_v58 = vld [vmem:[%s1504_s26 + $0x38] sm:$0xff]  ;;  %v501_v63 = vld [vmem:[#allocation2 + $0x90] sm:$0xff]  ;;  %v500_v5 = vld [vmem:[#allocation2 + $0x88] sm:$0xff] }
  0x38   : > { %1283 = vset.pattern.permute.xlu0 %v1392_v23  ;;  %1279 = vset.pattern.permute.xlu1 %v1392_v23  ;;  %v502_v59 = vld [vmem:[#allocation2 + $0x98] sm:$0xff]  ;;  %v532_v6 = vld [vmem:[#allocation2 + $0x188] sm:$0xff]  ;;  %v499_v9 = vld [vmem:[#allocation2 + $0x80] sm:$0xff] }
  0x39   : > { %278 = vperm.xlu0 %1283, %v267_v2   ;;  %284 = vperm.xlu1 %1279, %v269_v4   ;;  %v534_v60 = vld [vmem:[#allocation2 + $0x198] sm:$0xff]  ;;  %v533_v2 = vld [vmem:[#allocation2 + $0x190] sm:$0xff]  ;;  %v484_v7 = vld [vmem:[#allocation2 + $0x8] sm:$0xff] }
  0x3a   : > { %1123 = vmatpush3.msra.mxu1 %v524_v35  ;;  %1068 = vmatprep.subr.mxu0 %v507_v36  ;;  %v486_v61 = vld [vmem:[#allocation2 + $0x18] sm:$0xff]  ;;  %v516_v8 = vld [vmem:[#allocation2 + $0x108] sm:$0xff]  ;;  %v531_v10 = vld [vmem:[#allocation2 + $0x180] sm:$0xff] }
  0x3b   : > { %1124 = vmatprep.subr.mxu1 %v539_v37  ;;  %1069 = vmatpush3.msra.mxu0 %v491_v38  ;;  %v518_v62 = vld [vmem:[#allocation2 + $0x118] sm:$0xff]  ;;  %v483_v11 = vld [vmem:[#allocation2] sm:$0xff] }
  0x3c   : > { %1125 = vmatpush3.msra.mxu1 %v523_v40  ;;  %1070 = vmatprep.subr.mxu0 %v506_v41  ;;  %v515_v12 = vld [vmem:[#allocation2 + $0x100] sm:$0xff] }
  0x3d   : > { %281 = vperm.xlu0 %1283, %v268_v3   ;;  %1281 = vset.pattern.permute.xlu1 %v1390_v0  ;;  %v485_v3 = vld [vmem:[#allocation2 + $0x10] sm:$0xff] }
  0x3e   : > { %356 = vperm.xlu1 %1281, %v269_v4   ;;  %1126 = vmatprep.subr.mxu1 %v538_v42  ;;  %v517_v4 = vld [vmem:[#allocation2 + $0x110] sm:$0xff] }
  0x3f   : > { %1071 = vmatpush3.msra.mxu0 %v490_v43  ;;  %1127 = vmatpush3.msra.mxu1 %v522_v44  ;;  %v1394_v43 = vmov 1.0  }
  0x40   : > { %1072 = vmatprep.subr.mxu0 %v505_v45  ;;  %1128 = vmatprep.subr.mxu1 %v537_v46 }
  0x41   : > { %290 = vperm.xlu0 %1283, %v1519_v33   ;;  %1073 = vmatpush3.msra.mxu0 %v489_v47 }
  0x42   : > { %1282 = vset.pattern.permute.xlu1 %v1392_v23  ;;  %1129 = vmatpush3.msra.mxu1 %v521_v48  ;;  %v836_v48 = vld [vmem:[%s1821_s4 + $0x38] sm:$0xff] }
  0x43   : > { %287 = vperm.xlu1 %1282, %v1511_v14   ;;  %1074 = vmatprep.subr.mxu0 %v504_v49 }
  0x44   : > { %1130 = vmatprep.subr.mxu1 %v536_v50  ;;  %1075 = vmatpush3.msra.mxu0 %v488_v51 }
  0x45   : > { %293 = vperm.xlu0 %1283, %v1524_v39   ;;  %1131 = vmatpush3.msra.mxu1 %v520_v52 }
  0x46   : > { %1076 = vmatprep.subr.mxu0 %v503_v53  ;;  %1132 = vmatprep.subr.mxu1 %v535_v55 }
  0x47   : > { %1284 = vset.pattern.permute.xlu1 %v1390_v0  ;;  %1077 = vmatpush3.msra.mxu0 %v487_v56 }
  0x48   : > { %359 = vperm.xlu1 %1284, %v1511_v14   ;;  %1133 = vmatpush3.msra.mxu1 %v519_v57 }
  0x49   : > { %1288 = vset.pattern.permute.xlu0 %v1390_v0  ;;  %1078 = vmatprep.subr.mxu0 %v502_v59 }
  0x4a   : > { %365 = vperm.xlu0 %1288, %v1524_v39   ;;  %1134 = vmatprep.subr.mxu1 %v534_v60 }
  0x4b   : > { %1079 = vmatpush3.msra.mxu0 %v486_v61  ;;  %1135 = vmatpush3.msra.mxu1 %v518_v62 }
  0x4c   : > { %1285 = vset.pattern.permute.xlu1 %v1391_v1  ;;  %1080 = vmatprep.subr.mxu0 %v501_v63 }
  0x4d   : > { %322 = vperm.xlu1 %1285, %v1519_v33   ;;  %1136 = vmatprep.subr.mxu1 %v533_v2 }
  0x4e   : > { %368 = vperm.xlu0 %1288, %v273_v54   ;;  %1081 = vmatpush3.msra.mxu0 %v485_v3 }
  0x4f   : > { %1137 = vmatpush3.msra.mxu1 %v517_v4  ;;  %1082 = vmatprep.subr.mxu0 %v500_v5 }
  0x50   : > { %1138 = vmatprep.subr.mxu1 %v532_v6  ;;  %1083 = vmatpush3.msra.mxu0 %v484_v7 }
  0x51   : > { %1286 = vset.pattern.permute.xlu1 %v1390_v0  ;;  %1139 = vmatpush3.msra.mxu1 %v516_v8 }
  0x52   : > { %362 = vperm.xlu1 %1286, %v1519_v33   ;;  %1292 = vset.pattern.permute.xlu0 %v1391_v1 }
  0x53   : > { %331 = vperm.xlu0 %1292, %v274_v58   ;;  %1084 = vmatprep.subr.mxu0 %v499_v9 }
  0x54   : > { %1140 = vmatprep.subr.mxu1 %v531_v10  ;;  %1085 = vmatpush3.msra.mxu0 %v483_v11 }
  0x55   : > { %1141 = vmatpush3.msra.mxu1 %v515_v12  ;;  %1183 = vmatprep.subr.mxu0 %v1393_v13 }
  0x56   : > { %1287 = vset.pattern.permute.xlu1 %v1391_v1 }
  0x57   : > { %325 = vperm.xlu1 %1287, %v1524_v39   ;;  %1294 = vset.pattern.permute.xlu0 %v1390_v0 }
  0x5b   : > { %1289 = vset.pattern.permute.xlu1 %v1392_v23 }
  0x5c   : > { %296 = vperm.xlu1 %1289, %v273_v54  }
  0x60   : > { %1290 = vset.pattern.permute.xlu1 %v1391_v1 }
  0x61   : > { %328 = vperm.xlu1 %1290, %v273_v54  }
  0x65   : > { %1291 = vset.pattern.permute.xlu1 %v1392_v23 }
  0x66   : > { %299 = vperm.xlu1 %1291, %v274_v58  }
  0x6a   : > { %1293 = vset.pattern.permute.xlu1 %v1390_v0 }
  0x6b   : > { %371 = vperm.xlu1 %1293, %v274_v58  }
  0xa6   : > { %v311_v14 = vpop.permute.xlu1 %310  ;;  %v351_v15 = vpop.permute.xlu0 %350 }
  0xa7   : > { %vm373_vm0 = vcmp.eq.s32.totalorder %v1547_v21, %v351_v15  ;;  %vm333_vm1 = vcmp.eq.s32.totalorder %v1547_v21, %v311_v14 }
  0xaa   : > { %v314_v16 = vpop.permute.xlu1 %313 }
  0xab   : > { %v317_v17 = vpop.permute.xlu0 %316  ;;  %vm334_vm7 = vcmp.eq.s32.totalorder %v1547_v21, %v314_v16 }
  0xac   : > { %vm335_vm3 = vcmp.eq.s32.totalorder %v1547_v21, %v317_v17 }
  0xaf   : > { %v354_v19 = vpop.permute.xlu1 %353  ;;  %v320_v20 = vpop.permute.xlu0 %319 }
  0xb0   : > { %vm374_vm10 = vcmp.eq.s32.totalorder %v1547_v21, %v354_v19 }
  0xb4   : > { %v279_v22 = vpop.permute.xlu0 %278  ;;  %v285_v1 = vpop.permute.xlu1 %284 }
  0xb5   : > { %vm301_vm2 = vcmp.eq.s32.totalorder %v1547_v21, %v279_v22  ;;  %vm303_vm5 = vcmp.eq.s32.totalorder %v1547_v21, %v285_v1 }
  0xb6   : > { %vm341_vm4 = vmor %vm301_vm2, %vm333_vm1  ;;  %vm336_vm2 = vcmp.eq.s32.totalorder %v1547_v21, %v320_v20 }
  0xb7   : > { %vm1554_vm6 = vmor %vm341_vm4, %vm373_vm0  ;;  %vm431_vm0 = vcmask 1045504  }
  0xb8   : > { %v282_v23 = vpop.permute.xlu0 %281  ;;  %v1562_v24 = vsel %vm1554_vm6, 1.0, %v1393_v13  ;;  %vm343_vm8 = vmor %vm303_vm5, %vm335_vm3 }
  0xb9   : > { %vm302_vm9 = vcmp.eq.s32.totalorder %v1547_v21, %v282_v23  ;;  %v357_v25 = vpop.permute.xlu1 %356  ;;  %v432_v27 = vrot.slane %v1562_v24, 2  ;;  %v406_v30 = vrot.slane %v1562_v24, 1  ;;  %v458_v31 = vrot.slane %v1562_v24, 3  ;;  %v842_v24 = vld [vmem:[%s1821_s4 + $0x68] sm:$0xff] }
  0xba   : > { %vm342_vm11 = vmor %vm302_vm9, %vm334_vm7  ;;  %vm375_vm12 = vcmp.eq.s32.totalorder %v1547_v21, %v357_v25 }
  0xbb   : > { %vm1567_vm13 = vmor %vm342_vm11, %vm374_vm10 }
  0xbc   : > { %v390_v28 = vsel %vm1567_vm13, 1.0, %v1393_v13  ;;  %vm1575_vm1 = vmor %vm343_vm8, %vm375_vm12  ;;  %v291_v49 = vpop.permute.xlu0 %290 }
  0xbd   : > { %v433_v32 = vrot.slane %v390_v28, 2  ;;  %v391_v33 = vsel %vm1575_vm1, 1.0, %v1393_v13  ;;  %v407_v34 = vrot.slane %v390_v28, 1  ;;  %v459_v35 = vrot.slane %v390_v28, 3 }
  0xbe   : > { %v409_v36 = vrot.slane %v391_v33, 1  ;;  %v461_v37 = vrot.slane %v391_v33, 3  ;;  %v288_v38 = vpop.permute.xlu1 %287  ;;  %v435_v42 = vrot.slane %v391_v33, 2 }
  0xbf   : > { %v408_v39 = vsel %vm405_vm14, %v406_v30, %v407_v34  ;;  %v460_v40 = vsel %vm457_vm15, %v458_v31, %v459_v35  ;;  %v434_v41 = vsel %vm431_vm0, %v432_v27, %v433_v32  ;;  %vm304_vm3 = vcmp.eq.s32.totalorder %v1547_v21, %v288_v38 }
  0xc0   : > { %618 = vmatprep.mubr.f32.mxu0 %v408_v39  ;;  %723 = vmatprep.mubr.f32.mxu1 %v460_v40  ;;  %v410_v44 = vsel %vm405_vm14, %v407_v34, %v409_v36  ;;  %v462_v45 = vsel %vm457_vm15, %v459_v35, %v461_v37  ;;  %vm344_vm4 = vmor %vm304_vm3, %vm336_vm2  ;;  %v436_v47 = vsel %vm431_vm0, %v433_v32, %v435_v42  ;;  %v294_v58 = vpop.permute.xlu0 %293 }
  0xc1   : > { %1041 = vmatmul.mubr.msk.f32.vlgmr.msra.gmra.mxu0 %vm1554_vm6, %v1394_v43  ;;  %724 = vmatmul.mubr.f32.vlgmr.msra.gmra.mxu1 %v434_v41  ;;  %vm305_vm6 = vcmp.eq.s32.totalorder %v1547_v21, %v291_v49  ;;  %vm306_vm12 = vcmp.eq.s32.totalorder %v1547_v21, %v294_v58  ;;  %v835_v49 = vld [vmem:[%s1821_s4 + $0x30] sm:$0xff] }
  0xc2   : > { %623 = vmatprep.mubr.f32.mxu0 %v410_v44  ;;  %728 = vmatprep.mubr.f32.mxu1 %v462_v45  ;;  %v844_v45 = vld [vmem:[%s1821_s4 + $0x78] sm:$0xff] }
  0xc3   : > { %v360_v46 = vpop.permute.xlu1 %359  ;;  %1184 = vmatpush3.msra.mxu0 %v844_v45 }
  0xc4   : > { %vm376_vm5 = vcmp.eq.s32.totalorder %v1547_v21, %v360_v46  ;;  %1185 = vmatprep.subr.mxu0 %v1393_v13  ;;  %v838_v46 = vld [vmem:[%s1821_s4 + $0x48] sm:$0xff] }
  0xc5   : > { %vm1602_vm7 = vmor %vm344_vm4, %vm376_vm5  ;;  %1042 = vmatmul.mubr.msk.f32.gmra.mxu0 %vm1567_vm13, %v1394_v43  ;;  %729 = vmatmul.mubr.f32.gmra.mxu1 %v436_v47  ;;  %v366_v61 = vpop.permute.xlu0 %365  ;;  %v837_v47 = vld [vmem:[%s1821_s4 + $0x40] sm:$0xff] }
  0xc6   : > { %v392_v50 = vsel %vm1602_vm7, 1.0, %v1393_v13  ;;  %vm378_vm13 = vcmp.eq.s32.totalorder %v1547_v21, %v366_v61 }
  0xc7   : > { %v411_v51 = vrot.slane %v392_v50, 1  ;;  %v437_v52 = vrot.slane %v392_v50, 2  ;;  %v463_v53 = vrot.slane %v392_v50, 3  ;;  %v834_v50 = vld [vmem:[%s1821_s4 + $0x28] sm:$0xff] }
  0xc8   : > { %v323_v54 = vpop.permute.xlu1 %322 }
  0xc9   : > { %v412_v55 = vsel %vm405_vm14, %v409_v36, %v411_v51  ;;  %v464_v56 = vsel %vm457_vm15, %v461_v37, %v463_v53  ;;  %v438_v57 = vsel %vm431_vm0, %v435_v42, %v437_v52  ;;  %vm337_vm8 = vcmp.eq.s32.totalorder %v1547_v21, %v323_v54  ;;  %v369_v18 = vpop.permute.xlu0 %368  ;;  %v830_v54 = vld [vmem:[%s1821_s4 + $0x8] sm:$0xff] }
  0xca   : > { %628 = vmatprep.mubr.f32.mxu0 %v412_v55  ;;  %733 = vmatprep.mubr.f32.mxu1 %v464_v56  ;;  %vm345_vm9 = vmor %vm305_vm6, %vm337_vm8  ;;  %vm379_vm4 = vcmp.eq.s32.totalorder %v1547_v21, %v369_v18  ;;  %v829_v55 = vld [vmem:[%s1821_s4] sm:$0xff] }
  0xcb   : > { %1043 = vmatmul.mubr.msk.f32.gmra.mxu0 %vm1575_vm1, %v1394_v43  ;;  %734 = vmatmul.mubr.f32.gmra.mxu1 %v438_v57 }
  0xcd   : > { %v363_v59 = vpop.permute.xlu1 %362 }
  0xce   : > { %vm377_vm10 = vcmp.eq.s32.totalorder %v1547_v21, %v363_v59  ;;  %v332_v25 = vpop.permute.xlu0 %331 }
  0xcf   : > { %vm1621_vm11 = vmor %vm345_vm9, %vm377_vm10  ;;  %vm340_vm9 = vcmp.eq.s32.totalorder %v1547_v21, %v332_v25 }
  0xd0   : > { %v393_v62 = vsel %vm1621_vm11, 1.0, %v1393_v13 }
  0xd1   : > { %v413_v63 = vrot.slane %v393_v62, 1  ;;  %v439_v2 = vrot.slane %v393_v62, 2  ;;  %v465_v3 = vrot.slane %v393_v62, 3 }
  0xd2   : > { %v326_v4 = vpop.permute.xlu1 %325 }
  0xd3   : > { %vm338_vm1 = vcmp.eq.s32.totalorder %v1547_v21, %v326_v4  ;;  %v414_v5 = vsel %vm405_vm14, %v411_v51, %v413_v63  ;;  %v466_v6 = vsel %vm457_vm15, %v463_v53, %v465_v3  ;;  %v440_v7 = vsel %vm431_vm0, %v437_v52, %v439_v2  ;;  %v833_v51 = vld [vmem:[%s1821_s4 + $0x20] sm:$0xff]  ;;  %v832_v52 = vld [vmem:[%s1821_s4 + $0x18] sm:$0xff]  ;;  %v831_v53 = vld [vmem:[%s1821_s4 + $0x10] sm:$0xff] }
  0xd4   : > { %vm346_vm2 = vmor %vm306_vm12, %vm338_vm1  ;;  %633 = vmatprep.mubr.f32.mxu0 %v414_v5  ;;  %738 = vmatprep.mubr.f32.mxu1 %v466_v6  ;;  %vm864_vm1 = vcmask 1043459  }
  0xd5   : > { %vm1634_vm3 = vmor %vm346_vm2, %vm378_vm13  ;;  %1044 = vmatmul.mubr.msk.f32.gmra.mxu0 %vm1602_vm7, %v1394_v43  ;;  %739 = vmatmul.mubr.f32.gmra.mxu1 %v440_v7  ;;  %vm866_vm2 = vcmask 1044484  }
  0xd6   : > { %v394_v9 = vsel %vm1634_vm3, 1.0, %v1393_v13 }
  0xd7   : > { %v415_v10 = vrot.slane %v394_v9, 1  ;;  %v441_v11 = vrot.slane %v394_v9, 2  ;;  %v467_v12 = vrot.slane %v394_v9, 3  ;;  %v297_v14 = vpop.permute.xlu1 %296 }
  0xd8   : > { %vm307_vm5 = vcmp.eq.s32.totalorder %v1547_v21, %v297_v14 }
  0xd9   : > { %v416_v15 = vsel %vm405_vm14, %v413_v63, %v415_v10  ;;  %v468_v16 = vsel %vm457_vm15, %v465_v3, %v467_v12  ;;  %v442_v17 = vsel %vm431_vm0, %v439_v2, %v441_v11 }
  0xda   : > { %638 = vmatprep.mubr.f32.mxu0 %v416_v15  ;;  %743 = vmatprep.mubr.f32.mxu1 %v468_v16 }
  0xdb   : > { %1045 = vmatmul.mubr.msk.f32.gmra.mxu0 %vm1621_vm11, %v1394_v43  ;;  %744 = vmatmul.mubr.f32.gmra.mxu1 %v442_v17 }
  0xdc   : > { %v329_v19 = vpop.permute.xlu1 %328 }
  0xdd   : > { %vm339_vm7 = vcmp.eq.s32.totalorder %v1547_v21, %v329_v19 }
  0xde   : > { %vm347_vm6 = vmor %vm307_vm5, %vm339_vm7  ;;  %vm872_vm5 = vcmask 1047559  }
  0xdf   : > { %vm1653_vm8 = vmor %vm347_vm6, %vm379_vm4  ;;  %vm870_vm4 = vcmask 1046534  }
  0xe0   : > { %v395_v22 = vsel %vm1653_vm8, 1.0, %v1393_v13 }
  0xe1   : > { %v417_v1 = vrot.slane %v395_v22, 1  ;;  %v443_v0 = vrot.slane %v395_v22, 2  ;;  %v469_v23 = vrot.slane %v395_v22, 3  ;;  %v300_v26 = vpop.permute.xlu1 %299 }
  0xe2   : > { %vm308_vm10 = vcmp.eq.s32.totalorder %v1547_v21, %v300_v26 }
  0xe3   : > { %v418_v28 = vsel %vm405_vm14, %v415_v10, %v417_v1  ;;  %v470_v29 = vsel %vm457_vm15, %v467_v12, %v469_v23  ;;  %v444_v32 = vsel %vm431_vm0, %v441_v11, %v443_v0  ;;  %vm348_vm11 = vmor %vm308_vm10, %vm340_vm9  ;;  %v1761_v12 = vld [vmem:[%s1819_s2] ss:$0 sm:$0xff] }
  0xe4   : > { %643 = vmatprep.mubr.f32.mxu0 %v418_v28  ;;  %748 = vmatprep.mubr.f32.mxu1 %v470_v29 }
  0xe5   : > { %1046 = vmatmul.mubr.msk.f32.gmra.mxu0 %vm1634_vm3, %v1394_v43  ;;  %749 = vmatmul.mubr.f32.gmra.mxu1 %v444_v32  ;;  %vm868_vm3 = vcmask 1045509  }
  0xe6   : > { %v372_v33 = vpop.permute.xlu1 %371 }
  0xe7   : > { %vm380_vm12 = vcmp.eq.s32.totalorder %v1547_v21, %v372_v33 }
  0xe8   : > { %vm1669_vm13 = vmor %vm348_vm11, %vm380_vm12 }
  0xe9   : > { %v396_v35 = vsel %vm1669_vm13, 1.0, %v1393_v13 }
  0xea   : > { %v419_v36 = vrot.slane %v396_v35, 1  ;;  %v445_v37 = vrot.slane %v396_v35, 2  ;;  %v471_v38 = vrot.slane %v396_v35, 3 }
  0xec   : > { %v420_v39 = vsel %vm405_vm14, %v417_v1, %v419_v36  ;;  %v472_v40 = vsel %vm457_vm15, %v469_v23, %v471_v38  ;;  %v446_v41 = vsel %vm431_vm0, %v443_v0, %v445_v37  ;;  %v430_v21 = vsel %vm405_vm14, %v419_v36, %v406_v30  ;;  %v843_v30 = vld [vmem:[%s1821_s4 + $0x70] sm:$0xff] }
  0xed   : > { %648 = vmatprep.mubr.f32.mxu0 %v420_v39  ;;  %753 = vmatprep.mubr.f32.mxu1 %v472_v40  ;;  %v482_v42 = vsel %vm457_vm15, %v471_v38, %v458_v31  ;;  %v456_v44 = vsel %vm431_vm0, %v445_v37, %v432_v27  ;;  %v841_v27 = vld [vmem:[%s1821_s4 + $0x60] sm:$0xff]  ;;  %v840_v31 = vld [vmem:[%s1821_s4 + $0x58] sm:$0xff]  ;;  %vm1395_vm14 = vmmov 0   ;;  %vm860_vm15 = vcmask 1041409  }
  0xee   : > { %1047 = vmatmul.mubr.msk.f32.gmra.mxu0 %vm1653_vm8, %v1394_v43  ;;  %754 = vmatmul.mubr.f32.gmra.mxu1 %v446_v41  ;;  %vm862_vm0 = vcmask 1042434  }
  0xef   : > { %653 = vmatprep.mubr.f32.mxu0 %v430_v21  ;;  %758 = vmatprep.mubr.f32.mxu1 %v482_v42  ;;  %v772_v42 = vld [vmem:[%s1820_s3] sm:$0xff] }
  0xf0   : > { %1186 = vmatpush3.msra.mxu0 %v843_v30 }
  0xf1   : > { %1187 = vmatprep.subr.mxu0 %v1393_v13 }
  0xf2   : > { %1048 = vmatmul.mubr.msk.f32.gmra.mxu0 %vm1669_vm13, %v1394_v43  ;;  %759 = vmatmul.mubr.f32.gmra.mxu1 %v456_v44  ;;  %v839_v43 = vld [vmem:[%s1821_s4 + $0x50] sm:$0xff] }
  0xf3   : > { %1188 = vmatpush3.msra.mxu0 %v842_v24  ;;  %1215 = vmatprep.mubr.msk.f32.mxu0 %vm1395_vm14, %v1393_v13 }
  0xf4   : > { %1189 = vmatprep.subr.mxu0 %v1393_v13 }
  0xf5   : > { %1190 = vmatpush3.msra.mxu0 %v841_v27 }
  0xf6   : > { %1191 = vmatprep.subr.mxu0 %v1393_v13 }
  0xf7   : > { %1192 = vmatpush3.msra.mxu0 %v840_v31 }
  0xf8   : > { %1193 = vmatprep.subr.mxu0 %v1393_v13 }
  0xf9   : > { %1194 = vmatpush3.msra.mxu0 %v839_v43 }
  0xfa   : > { %1195 = vmatprep.subr.mxu0 %v1393_v13 }
  0xfb   : > { %1196 = vmatpush3.msra.mxu0 %v838_v46 }
  0xfc   : > { %1197 = vmatprep.subr.mxu0 %v1393_v13 }
  0xfd   : > { %1198 = vmatpush3.msra.mxu0 %v837_v47 }
  0xfe   : > { %1199 = vmatprep.subr.mxu0 %v1393_v13 }
  0xff   : > { %1200 = vmatpush3.msra.mxu0 %v836_v48 }
 0x100   : > { %1201 = vmatprep.subr.mxu0 %v1393_v13 }
 0x101   : > { %1202 = vmatpush3.msra.mxu0 %v835_v49 }
 0x102   : > { %1203 = vmatprep.subr.mxu0 %v1393_v13 }
 0x103   : > { %1204 = vmatpush3.msra.mxu0 %v834_v50 }
 0x104   : > { %1205 = vmatprep.subr.mxu0 %v1393_v13 }
 0x105   : > { %1206 = vmatpush3.msra.mxu0 %v833_v51 }
 0x106   : > { %1207 = vmatprep.subr.mxu0 %v1393_v13 }
 0x107   : > { %1208 = vmatpush3.msra.mxu0 %v832_v52 }
 0x108   : > { %1209 = vmatprep.subr.mxu0 %v1393_v13 }
 0x109   : > { %1210 = vmatpush3.msra.mxu0 %v831_v53 }
 0x10a   : > { %1211 = vmatprep.subr.mxu0 %v1393_v13 }
 0x10b   : > { %1212 = vmatpush3.msra.mxu0 %v830_v54 }
 0x10c   : > { %1213 = vmatprep.subr.mxu0 %v1393_v13 }
 0x10d   : > { %1214 = vmatpush3.msra.mxu0 %v829_v55 }
 0x181   : > { %v1086_v56 = vpop.f32.mrf.mxu0  ;;  %v1142_v57 = vpop.f32.mrf.mxu1 }
 0x183   : > { %v1087_v58 = vpop.f32.mrf.mxu0  ;;  %v1143_v59 = vpop.f32.mrf.mxu1 }
 0x184   : > { %v1088_v11 = vadd.f32 %v1087_v58, %v1086_v56  ;;  %v1144_v25 = vadd.f32 %v1143_v59, %v1142_v57 }
 0x185   : > { %v1089_v60 = vpop.f32.mrf.mxu0  ;;  %v1145_v61 = vpop.f32.mrf.mxu1 }
 0x186   : > { %v621_v19 = vadd.f32 %v1088_v11, %v1761_v12 }
 0x187   : > { %v1090_v62 = vpop.f32.mrf.mxu0  ;;  %v1146_v63 = vpop.f32.mrf.mxu1 }
 0x188   : > { %v1091_v9 = vadd.f32 %v1090_v62, %v1089_v60  ;;  %v1147_v1 = vadd.f32 %v1146_v63, %v1145_v61  ;;  %v726_v33 = vadd.f32 %v1144_v25, %v621_v19 }
 0x18a   : > { %v626_v17 = vadd.f32 %v1091_v9, %v1761_v12  ;;  %v764_v41 = vmax.f32 %v726_v33, 0.0 }
 0x18b   : > { %v1092_v2 = vpop.f32.mrf.mxu0  ;;  %v1148_v3 = vpop.f32.mrf.mxu1 }
 0x18c   : > { %v731_v29 = vadd.f32 %v1147_v1, %v626_v17  ;;  %v773_v43 = vmul.f32 %v772_v42, %v764_v41 }
 0x18d   : > { %v1093_v4 = vpop.f32.mrf.mxu0  ;;  %v1149_v5 = vpop.f32.mrf.mxu1 }
 0x18e   : > { %v1094_v13 = vadd.f32 %v1093_v4, %v1092_v2  ;;  %v1150_v26 = vadd.f32 %v1149_v5, %v1148_v3  ;;  %v765_v38 = vmax.f32 %v731_v29, 0.0  ;;  %v781_v53 = vrot.slane %v773_v43, 4 }
 0x190   : > { %v631_v20 = vadd.f32 %v1094_v13, %v1761_v12  ;;  %v774_v31 = vmul.f32 %v772_v42, %v765_v38  ;;  %v782_v3 = vmax.f32 %v773_v43, %v781_v53 }
 0x192   : > { %v736_v34 = vadd.f32 %v1150_v26, %v631_v20  ;;  %v787_v52 = vrot.slane %v774_v31, 4  ;;  %v783_v19 = vrot.slane %v782_v3, 2 }
 0x194   : > { %v766_v21 = vmax.f32 %v736_v34, 0.0  ;;  %v788_v63 = vmax.f32 %v774_v31, %v787_v52  ;;  %v784_v34 = vmax.f32 %v782_v3, %v783_v19  ;;  %v1049_v3 = vld [vmem:[%s1822_s5] ss:$0 sm:$0xff] }
 0x195   : > { %v1095_v6 = vpop.f32.mrf.mxu0  ;;  %v1151_v7 = vpop.f32.mrf.mxu1 }
 0x196   : > { %v775_v46 = vmul.f32 %v772_v42, %v766_v21 }
 0x197   : > { %v1096_v8 = vpop.f32.mrf.mxu0  ;;  %v1152_v10 = vpop.f32.mrf.mxu1 }
 0x198   : > { %v1097_v14 = vadd.f32 %v1096_v8, %v1095_v6  ;;  %v1153_v32 = vadd.f32 %v1152_v10, %v1151_v7  ;;  %v793_v54 = vrot.slane %v775_v46, 4 }
 0x19a   : > { %v636_v0 = vadd.f32 %v1097_v14, %v1761_v12  ;;  %v794_v4 = vmax.f32 %v775_v46, %v793_v54 }
 0x19b   : > { %v1098_v15 = vpop.f32.mrf.mxu0  ;;  %v1154_v16 = vpop.f32.mrf.mxu1 }
 0x19c   : > { %v741_v36 = vadd.f32 %v1153_v32, %v636_v0  ;;  %v795_v20 = vrot.slane %v794_v4, 2 }
 0x19d   : > { %v1099_v18 = vpop.f32.mrf.mxu0  ;;  %v1155_v23 = vpop.f32.mrf.mxu1 }
 0x19e   : > { %v1100_v22 = vadd.f32 %v1099_v18, %v1098_v15  ;;  %v1156_v35 = vadd.f32 %v1155_v23, %v1154_v16  ;;  %v767_v44 = vmax.f32 %v741_v36, 0.0  ;;  %v789_v15 = vrot.slane %v788_v63, 2 }
 0x19f   : > { %v796_v33 = vmax.f32 %v794_v4, %v795_v20 }
 0x1a0   : > { %v641_v28 = vadd.f32 %v1100_v22, %v1761_v12  ;;  %v776_v49 = vmul.f32 %v772_v42, %v767_v44  ;;  %v790_v26 = vmax.f32 %v788_v63, %v789_v15 }
 0x1a1   : > { %v797_v44 = vrot.slane %v796_v33, 1 }
 0x1a2   : > { %v746_v37 = vadd.f32 %v1156_v35, %v641_v28  ;;  %v799_v58 = vrot.slane %v776_v49, 4 }
 0x1a4   : > { %v768_v24 = vmax.f32 %v746_v37, 0.0  ;;  %v800_v8 = vmax.f32 %v776_v49, %v799_v58 }
 0x1a5   : > { %v1101_v39 = vpop.f32.mrf.mxu0  ;;  %v1157_v40 = vpop.f32.mrf.mxu1 }
 0x1a6   : > { %v777_v50 = vmul.f32 %v772_v42, %v768_v24  ;;  %v801_v22 = vrot.slane %v800_v8, 2 }
 0x1a7   : > { %v1102_v45 = vpop.f32.mrf.mxu0  ;;  %v1158_v30 = vpop.f32.mrf.mxu1 }
 0x1a8   : > { %v1103_v27 = vadd.f32 %v1102_v45, %v1101_v39  ;;  %v1159_v48 = vadd.f32 %v1158_v30, %v1157_v40  ;;  %v805_v59 = vrot.slane %v777_v50, 4  ;;  %v802_v35 = vmax.f32 %v800_v8, %v801_v22 }
 0x1a9   : > { %v791_v39 = vrot.slane %v790_v26, 1  ;;  %v785_v45 = vrot.slane %v784_v34, 1 }
 0x1aa   : > { %v646_v47 = vadd.f32 %v1103_v27, %v1761_v12  ;;  %v806_v11 = vmax.f32 %v777_v50, %v805_v59  ;;  %v803_v30 = vrot.slane %v802_v35, 1 }
 0x1ab   : > { %v792_v31 = vmax.f32 %v790_v26, %v791_v39  ;;  %v786_v49 = vmax.f32 %v784_v34, %v785_v45 }
 0x1ac   : > { %v751_v51 = vadd.f32 %v1159_v48, %v646_v47  ;;  %v807_v25 = vrot.slane %v806_v11, 2  ;;  %v798_v48 = vmax.f32 %v796_v33, %v797_v44  ;;  %v804_v50 = vmax.f32 %v802_v35, %v803_v30 }
 0x1ae   : > { %v769_v55 = vmax.f32 %v751_v51, 0.0  ;;  %v1104_v56 = vpop.f32.mrf.mxu0  ;;  %v1160_v57 = vpop.f32.mrf.mxu1  ;;  %v808_v38 = vmax.f32 %v806_v11, %v807_v25 }
 0x1b0   : > { %v778_v60 = vmul.f32 %v772_v42, %v769_v55  ;;  %v1105_v61 = vpop.f32.mrf.mxu0  ;;  %v1161_v62 = vpop.f32.mrf.mxu1  ;;  %v809_v27 = vrot.slane %v808_v38, 1 }
 0x1b1   : > { %v1106_v2 = vadd.f32 %v1105_v61, %v1104_v56  ;;  %v1162_v10 = vadd.f32 %v1161_v62, %v1160_v57 }
 0x1b2   : > { %v811_v5 = vrot.slane %v778_v60, 4  ;;  %v1107_v6 = vpop.f32.mrf.mxu0  ;;  %v1163_v7 = vpop.f32.mrf.mxu1  ;;  %v810_v53 = vmax.f32 %v808_v38, %v809_v27 }
 0x1b3   : > { %v651_v9 = vadd.f32 %v1106_v2, %v1761_v12 }
 0x1b4   : > { %v1108_v13 = vpop.f32.mrf.mxu0  ;;  %v1164_v14 = vpop.f32.mrf.mxu1  ;;  %v812_v16 = vmax.f32 %v778_v60, %v811_v5 }
 0x1b5   : > { %v756_v17 = vadd.f32 %v1162_v10, %v651_v9  ;;  %v1109_v18 = vadd.f32 %v1108_v13, %v1107_v6  ;;  %v1165_v23 = vadd.f32 %v1164_v14, %v1163_v7 }
 0x1b6   : > { %v813_v28 = vrot.slane %v812_v16, 2 }
 0x1b7   : > { %v770_v1 = vmax.f32 %v756_v17, 0.0  ;;  %v656_v0 = vadd.f32 %v1109_v18, %v1761_v12 }
 0x1b8   : > { %v814_v40 = vmax.f32 %v812_v16, %v813_v28 }
 0x1b9   : > { %v779_v29 = vmul.f32 %v772_v42, %v770_v1  ;;  %v761_v32 = vadd.f32 %v1165_v23, %v656_v0 }
 0x1ba   : > { %v815_v43 = vrot.slane %v814_v40, 1 }
 0x1bb   : > { %v817_v36 = vrot.slane %v779_v29, 4  ;;  %v771_v37 = vmax.f32 %v761_v32, 0.0 }
 0x1bc   : > { %v816_v54 = vmax.f32 %v814_v40, %v815_v43 }
 0x1bd   : > { %v818_v41 = vmax.f32 %v779_v29, %v817_v36  ;;  %v780_v21 = vmul.f32 %v772_v42, %v771_v37  ;;  %v861_v42 = vsel %vm860_vm15, %v792_v31, %v786_v49 }
 0x1be   : > { %v863_v56 = vsel %vm862_vm0, %v798_v48, %v861_v42 }
 0x1bf   : > { %v819_v12 = vrot.slane %v818_v41, 2  ;;  %v823_v24 = vrot.slane %v780_v21, 4  ;;  %v865_v59 = vsel %vm864_vm1, %v804_v50, %v863_v56 }
 0x1c0   : > { %v867_v60 = vsel %vm866_vm2, %v810_v53, %v865_v59 }
 0x1c1   : > { %v820_v46 = vmax.f32 %v818_v41, %v819_v12  ;;  %v824_v47 = vmax.f32 %v780_v21, %v823_v24  ;;  %v869_v62 = vsel %vm868_vm3, %v816_v54, %v867_v60 }
 0x1c3   : > { %v821_v51 = vrot.slane %v820_v46, 1  ;;  %v825_v52 = vrot.slane %v824_v47, 2 }
 0x1c5   : > { %v826_v55 = vmax.f32 %v824_v47, %v825_v52  ;;  %v822_v57 = vmax.f32 %v820_v46, %v821_v51 }
 0x1c7   : > { %v827_v58 = vrot.slane %v826_v55, 1  ;;  %v871_v63 = vsel %vm870_vm4, %v822_v57, %v869_v62 }
 0x1c9   : > { %v828_v61 = vmax.f32 %v826_v55, %v827_v58 }
 0x1cb   : > { %v873_v2 = vsel %vm872_vm5, %v828_v61, %v871_v63 }
 0x1cc   : > { %1216 = vmatmul.mubr.f32.vlgmr.msra.gmra.mxu0 %v873_v2 }
 0x28c   : > { %v941_v4 = vpop.f32.mrf.mxu0 }
 0x28d   : > { %v942_v5 = vadd.f32 %v1049_v3, %v941_v4 }
 0x28e   : > { %v1217_v6 = vpop.f32.mrf.mxu0 }
 0x28f   : > { %945 = vst [vmem:[%s260_s18] sm:$0xff] %v942_v5 }
 0x290   : > { %1334 = shalt.err (!%p1331_p0)
}
 0x291   : > { %s1335_s12 = scalar_lea.hbm %s1782_s28, 128  ;;  %s1339_s15 = scalar_lea.hbm %s1823_s6, 256 }
 0x292   : > { %p1336_p1 = scmp.ne.s32.totalorder %s1782_s28, %s1335_s12  ;;  %p1340_p4 = scmp.lt.s32.totalorder %s1782_s28, %s1823_s6 }
 0x293   : > { %p1341_p7 = scmp.lt.s32.totalorder %s1339_s15, %s1335_s12 }
 0x294   : > { %p1337_p2 = pnand %p1336_p1, %p1470_p5 }
 0x295   : > { %p1342_p6 = por %p1341_p7, %p1340_p4 }
 0x296   : > { %p1338_p3 = pneg %p1337_p2 }
 0x298   : > { %p1343_p8 = pnand %p1342_p6, %p1338_p3 }
 0x29a   : > { %1346 = shalt.err (!%p1343_p8)
}
 0x29b   : > { %1222 = dma.vmem_to_hbm [thread:$0]  (%p1470_p5), %s961_s19, 128, %s1782_s28, %s947_s29  }
 0x29c PF: > { %p1234_p9 = scmp.ge.s32.totalorder %s1385_s24, 2  ;;  %s972_s18 = sand.u32 1, %s1373_s21  }
 0x29d   : > { %p1843_p10 = scmp.ne.s32.totalorder %s1825_s8, 0  ;;  %s973_s20 = scalar_lea.sflag [#allocation4], %s972_s18 }
 0x29f   : > { %p1229_p11 = pnand %p1234_p9, %p1843_p10 }
 0x2a1   : > { %p1230_p12 = pneg %p1229_p11 }
 0x2a3   : > { %1368 = dma.done.wait (%p1230_p12), %s973_s20, 128  }
 0x2a4   : > { %1370 = vsyncadd (%p1230_p12), %s973_s20, 4294967168  ;;  %p17_p13 = scmp.ge.s32.totalorder %s1457_s27, 4   ;;  %s1844_s21 = smov %s1377_s22 }
 0x2a5   : > { %s1845_s22 = smov %s1381_s23  ;;  %s1846_s23 = smov %s1468_s30 }
 0x2a6   : > { %s1847_s24 = smov %s1457_s27  ;;  %19 = sbr.rel (!%p17_p13) target bundleno = 4 (0x4), region = 84 }
 0x2ab   :  { %978 = vsyncpa [#allocation3], 1 }
 0x2ac   :  { %980 = vsyncpa [#allocation3 + $0x1], 1 }
 0x2ad   :  { %981 = vsyncpa [#allocation4], 1 }
 0x2ae   :  { %983 = vsyncpa [#allocation4 + $0x1], 1 }

</bundles_post_ra>
